<compile_context>
chip_gen: v6e
topology: v6e:2x2x1
jax: 0.10.0
libtpu: 0.0.40
codegen_flags: <defaults>
</compile_context>

<pallas_src>
import functools
import math
from typing import NamedTuple, Optional

import jax
import jax.numpy as jnp
from jax.experimental import pallas as pl
from jax.experimental.pallas import tpu as pltpu


def _round_up(v, m):
    return ((v + m - 1) // m) * m


def _sublane_multiple(dtype) -> int:
    bits = jnp.dtype(dtype).itemsize * 8
    if bits >= 32:
        return 8
    if bits == 16:
        return 16
    return 32


@functools.lru_cache(maxsize=1)
def _tpu_config():
    """Per-generation defaults: base row tile, VMEM budget, scoped VMEM limit."""
    try:
        kind = jax.devices()[0].device_kind.lower()
    except Exception:
        kind = ""
    if "v2" in kind or "v3" in kind:
        return dict(base_tile=256, vmem_bytes=16 << 20, vmem_limit=14 << 20, two_tc=False)
    if "v4" in kind:
        return dict(base_tile=512, vmem_bytes=128 << 20, vmem_limit=96 << 20, two_tc=True)
    if "v5" in kind:
        return dict(base_tile=256, vmem_bytes=128 << 20, vmem_limit=96 << 20, two_tc=False)
    if "v6" in kind:
        return dict(base_tile=1024, vmem_bytes=128 << 20, vmem_limit=96 << 20, two_tc=False)
    # v7x and newer: 64 MiB VMEM per TensorCore, 2 TensorCores per chip.
    return dict(base_tile=512, vmem_bytes=64 << 20, vmem_limit=48 << 20, two_tc=True)


# --------------------------------------------------------------------------- #
# Kernel
# --------------------------------------------------------------------------- #
def _grn_kernel(x_ref, wcat_ref, bcat_ref, w2_ref, aux_ref, o_ref, *,
                out_dim, has_skip):
    """One row tile of the GRN.

    x_ref    : (R, in_dim)                input rows (native dtype)
    wcat_ref : (in_dim, hid_pad+n*out_pad)[W1 | Wg | (Ws)] fused, 128-padded
    bcat_ref : (1, hid_pad + n*out_pad)   [b1 | bg | (bs)] fused (f32)
    w2_ref   : (hid_pad, out_pad)         fc2 weight, 128-padded
    aux_ref  : (3, out_pad)               rows = [b2; gamma; beta] (f32)
    o_ref    : (R, out_pad)               lane-dense output tile
    """
    x = x_ref[...]
    in_dim = x.shape[-1]
    hid_pad = w2_ref.shape[0]
    out_pad = o_ref.shape[-1]

    # ---- fused matmul: fc1 | gate | (skip) in a single MXU pass ------------
    xm = x.astype(wcat_ref.dtype) if x.dtype != wcat_ref.dtype else x
    z = jnp.dot(xm, wcat_ref[...], preferred_element_type=jnp.float32)
    z = z + bcat_ref[...].astype(jnp.float32)

    h_pre = z[:, :hid_pad]
    g_pre = z[:, hid_pad:hid_pad + out_pad]
    if has_skip:
        skip = z[:, hid_pad + out_pad:hid_pad + 2 * out_pad]
    else:
        # input_dim == output_dim: identity skip; zero-extend to out_pad lanes
        # inside VMEM instead of lane-padding x in HBM.
        skip = x.astype(jnp.float32)
        if in_dim != out_pad:
            skip = jnp.concatenate(
                [skip, jnp.zeros((skip.shape[0], out_pad - in_dim), jnp.float32)],
                axis=-1)

    # ---- ELU (alpha=1) -----------------------------------------------------
    h = jnp.where(h_pre > 0.0, h_pre, jnp.exp(jnp.minimum(h_pre, 0.0)) - 1.0)
    # TODO(synk): dropout is identity (inference mode).

    # ---- fc2 ---------------------------------------------------------------
    h = jnp.dot(h.astype(w2_ref.dtype), w2_ref[...],
                preferred_element_type=jnp.float32)
    h = h + aux_ref[0:1, :].astype(jnp.float32)             # b2

    # ---- gate & residual mix (3 VALU ops) ----------------------------------
    g = jax.nn.sigmoid(jnp.clip(g_pre, -10.0, 10.0))
    out = skip + g * (h - skip)                              # padded lanes == 0

    # ---- LayerNorm over the REAL out_dim features ---------------------------
    # Padded lanes of `out` are exactly zero (zero-padded weights/biases/skip),
    # so plain sums over the full lane width equal sums over the real lanes.
    inv_n = 1.0 / float(out_dim)
    s = jnp.sum(out, axis=-1, keepdims=True)
    sq = jnp.sum(out * out, axis=-1, keepdims=True)
    mean = s * inv_n
    var = jnp.maximum(sq * inv_n - mean * mean, 0.0)
    y = (out - mean) * jax.lax.rsqrt(var + 1e-5)
    y = y * aux_ref[1:2, :].astype(jnp.float32) + aux_ref[2:3, :].astype(jnp.float32)

    o_ref[...] = y.astype(o_ref.dtype)


# --------------------------------------------------------------------------- #
# Parameter fusion (hoisted out of the per-call path)
# --------------------------------------------------------------------------- #
class GRNFused(NamedTuple):
    wcat: jax.Array     # (in_dim, hid_pad + n*out_pad)
    bcat: jax.Array     # (1, hid_pad + n*out_pad), f32
    w2p: jax.Array      # (hid_pad, out_pad)
    aux: jax.Array      # (3, out_pad), rows = [b2; gamma; beta], f32
    in_dim: int
    hid_dim: int
    out_dim: int
    hid_pad: int
    out_pad: int
    has_skip: bool


def prepare_grn_params(params, *, mxu_dtype: Optional[jnp.dtype] = None) -> GRNFused:
    """Build fused/padded weight blocks once (call at init, reuse per forward).

    mxu_dtype: optional dtype for the matmul operands (e.g. jnp.bfloat16) —
    accumulation stays f32 and the epilogue stays f32.
    """
    w1, b1, w2, b2, wg, bg, ws, bs, gamma, beta = params
    in_dim, hid_dim = w1.shape
    out_dim = w2.shape[1]
    has_skip = ws is not None

    hid_pad = _round_up(hid_dim, 128)
    out_pad = _round_up(out_dim, 128)
    wd = jnp.dtype(mxu_dtype) if mxu_dtype is not None else w1.dtype

    def pad2(w, r, c):
        w = w.astype(wd)
        return jnp.pad(w, ((0, r - w.shape[0]), (0, c - w.shape[1])))

    def pad_row(b, c):
        b = jnp.asarray(b, jnp.float32).reshape(1, -1)
        return jnp.pad(b, ((0, 0), (0, c - b.shape[1])))

    parts_w = [pad2(w1, in_dim, hid_pad), pad2(wg, in_dim, out_pad)]
    parts_b = [pad_row(b1, hid_pad), pad_row(bg, out_pad)]
    if has_skip:
        parts_w.append(pad2(ws, in_dim, out_pad))
        parts_b.append(pad_row(bs, out_pad))
    wcat = jnp.concatenate(parts_w, axis=1)
    bcat = jnp.concatenate(parts_b, axis=1)

    w2p = pad2(w2, hid_pad, out_pad)
    aux = jnp.concatenate([pad_row(b2, out_pad),
                           pad_row(gamma, out_pad),
                           pad_row(beta, out_pad)], axis=0)    # (3, out_pad)
    return GRNFused(wcat, bcat, w2p, aux,
                    in_dim, hid_dim, out_dim, hid_pad, out_pad, has_skip)


def _pick_row_tile(rows, in_dim, cat_w, hid_pad, out_pad, x_dtype, w_dtype, sub):
    cfg = _tpu_config()
    x_b = jnp.dtype(x_dtype).itemsize
    w_b = jnp.dtype(w_dtype).itemsize

    # Per-row VMEM bytes: f32 intermediates (z, h, g/skip/out) + double-buffered
    # x and output tiles.
    per_row = 4 * (cat_w + hid_pad + 3 * out_pad) + 2 * x_b * in_dim + 2 * x_b * out_pad
    # Single-buffered grid-invariant operands.
    weight_bytes = w_b * (in_dim * cat_w + hid_pad * out_pad) + 4 * (cat_w + 3 * out_pad)

    budget = cfg["vmem_bytes"] // 2 - weight_bytes
    cap = max(sub, budget // max(per_row, 1))
    tile = min(cfg["base_tile"], cap)

    # On 2-TensorCore chips make sure the "parallel" row axis has >= 2 steps.
    if cfg["two_tc"] and rows > sub:
        tile = min(tile, _round_up(pl.cdiv(rows, 2), sub))

    tile = min(tile, _round_up(rows, sub))
    tile = max(sub, (tile // sub) * sub)
    return int(tile)


# --------------------------------------------------------------------------- #
# Forward wrapper
# --------------------------------------------------------------------------- #
def grn_forward(x, fused: GRNFused, *, row_tile=None):
    """x: (..., input_dim) -> (..., output_dim)."""
    in_dim, out_dim = fused.in_dim, fused.out_dim
    hid_pad, out_pad = fused.hid_pad, fused.out_pad
    cat_w = fused.wcat.shape[1]

    orig_shape = x.shape
    assert orig_shape[-1] == in_dim
    rows = math.prod(orig_shape[:-1]) if len(orig_shape) > 1 else 1
    x2 = x.reshape(rows, in_dim)

    sub = _sublane_multiple(x.dtype)
    if row_tile is None:
        row_tile = _pick_row_tile(rows, in_dim, cat_w, hid_pad, out_pad,
                                  x.dtype, fused.wcat.dtype, sub)
    # User-supplied tiles are forced to a legal sublane multiple.
    row_tile = max(sub, _round_up(int(row_tile), sub))
    row_tile = min(row_tile, _round_up(rows, sub))

    grid = (pl.cdiv(rows, row_tile),)   # partial last block is masked by Pallas
    kernel = functools.partial(_grn_kernel, out_dim=out_dim,
                               has_skip=fused.has_skip)
    cfg = _tpu_config()

    # TODO(synk): on v5e, if profiling shows exposed per-step DMA latency,
    # deepen x/out pipelining with pipeline_mode=pl.Buffered(3).
    out = pl.pallas_call(
        kernel,
        out_shape=jax.ShapeDtypeStruct((rows, out_pad), x.dtype),
        grid_spec=pltpu.PrefetchScalarGridSpec(
            num_scalar_prefetch=0,
            grid=grid,
            in_specs=[
                pl.BlockSpec((row_tile, in_dim), lambda i: (i, 0)),     # x rows
                pl.BlockSpec((in_dim, cat_w), lambda i: (0, 0),         # [W1|Wg|(Ws)]
                             pipeline_mode=pl.Buffered(1)),
                pl.BlockSpec((1, cat_w), lambda i: (0, 0),              # [b1|bg|(bs)]
                             pipeline_mode=pl.Buffered(1)),
                pl.BlockSpec((hid_pad, out_pad), lambda i: (0, 0),      # W2
                             pipeline_mode=pl.Buffered(1)),
                pl.BlockSpec((3, out_pad), lambda i: (0, 0),            # [b2;gamma;beta]
                             pipeline_mode=pl.Buffered(1)),
            ],
            out_specs=pl.BlockSpec((row_tile, out_pad), lambda i: (i, 0)),
        ),
        compiler_params=pltpu.CompilerParams(
            dimension_semantics=("parallel",),     # shards rows across TCs
            vmem_limit_bytes=cfg["vmem_limit"]),
    )(x2, fused.wcat, fused.bcat, fused.w2p, fused.aux)

    out = out[:, :out_dim]
    return out.reshape(orig_shape[:-1] + (out_dim,))


# --------------------------------------------------------------------------- #
# Parameter init (matches the PyTorch module's _init_weights) and a plain-JAX
# reference for correctness checking.
# --------------------------------------------------------------------------- #
def _xavier_uniform(key, in_dim, out_dim, dtype=jnp.float32):
    bound = (6.0 / (in_dim + out_dim)) ** 0.5
    return jax.random.uniform(key, (in_dim, out_dim), dtype, -bound, bound)


def init_grn_params(key, input_dim, hidden_dim, output_dim, dtype=jnp.float32):
    k1, k2, k3, k4 = jax.random.split(key, 4)
    w1 = _xavier_uniform(k1, input_dim, hidden_dim, dtype)
    b1 = jnp.zeros((1, hidden_dim), dtype)
    w2 = _xavier_uniform(k2, hidden_dim, output_dim, dtype)
    b2 = jnp.zeros((1, output_dim), dtype)
    wg = _xavier_uniform(k3, input_dim, output_dim, dtype)
    bg = jnp.zeros((1, output_dim), dtype)
    if input_dim != output_dim:
        ws = _xavier_uniform(k4, input_dim, output_dim, dtype)
        bs = jnp.zeros((1, output_dim), dtype)
    else:
        ws = None                      # identity skip: skip = x, no matmul
        bs = None
    gamma = jnp.ones((1, output_dim), dtype)
    beta = jnp.zeros((1, output_dim), dtype)
    return (w1, b1, w2, b2, wg, bg, ws, bs, gamma, beta)


def _grn_reference(x, params):
    w1, b1, w2, b2, wg, bg, ws, bs, gamma, beta = params
    h = jax.nn.elu(x @ w1 + b1)
    h = h @ w2 + b2
    skip = (x @ ws + bs) if ws is not None else x
    g = jax.nn.sigmoid(jnp.clip(x @ wg + bg, -10.0, 10.0))
    out = g * h + (1.0 - g) * skip
    mean = out.mean(-1, keepdims=True)
    var = ((out - mean) ** 2).mean(-1, keepdims=True)
    return (out - mean) * jax.lax.rsqrt(var + 1e-5) * gamma + beta


if __name__ == "__main__":
    key = jax.random.PRNGKey(0)
    kx1, kp1, kx2, kp2 = jax.random.split(key, 4)
    batch, seq = 2, 8

    # Case 1: input_dim != output_dim -> learned skip layer (fused into wcat).
    in1, hid1, out1 = 8, 32, 16
    x1 = jax.random.normal(kx1, (batch, seq, in1), dtype=jnp.float32)
    p1 = init_grn_params(kp1, in1, hid1, out1)
    f1 = prepare_grn_params(p1)                       # fused once, reused
    y1 = jax.block_until_ready(grn_forward(x1, f1))
    r1 = _grn_reference(x1, p1)
    assert y1.shape == (batch, seq, out1)
    assert jnp.allclose(y1, r1, atol=1e-3, rtol=1e-3), float(jnp.max(jnp.abs(y1 - r1)))

    # Case 2: input_dim == output_dim -> identity skip, and rows (3*5=15) that
    # are NOT a multiple of the row tile, exercising the masked partial block.
    in2, hid2, out2 = 16, 32, 16
    x2 = jax.random.normal(kx2, (3, 5, in2), dtype=jnp.float32)
    p2 = init_grn_params(kp2, in2, hid2, out2)
    f2 = prepare_grn_params(p2)
    y2 = jax.block_until_ready(grn_forward(x2, f2))
    r2 = _grn_reference(x2, p2)
    assert y2.shape == (3, 5, out2)
    assert jnp.allclose(y2, r2, atol=1e-3, rtol=1e-3), float(jnp.max(jnp.abs(y2 - r2)))

    # Case 3: bf16 MXU operands (f32 accumulation + f32 epilogue).
    f1_bf16 = prepare_grn_params(p1, mxu_dtype=jnp.bfloat16)
    y3 = jax.block_until_ready(grn_forward(x1, f1_bf16))
    assert y3.shape == (batch, seq, out1)
    assert bool(jnp.all(jnp.isfinite(y3)))
    assert float(jnp.max(jnp.abs(y3 - r1))) < 0.25

    print("KERNEL_OK")
</pallas_src>

<mosaic_0001>
module attributes {stable_mosaic.version = 11 : i64} {
  func.func @_grn_kernel(%arg0: i32, %arg1: memref<8x8xf32, #tpu.memory_space<vmem>>, %arg2: memref<8x384xf32, #tpu.memory_space<vmem>>, %arg3: memref<1x384xf32, #tpu.memory_space<vmem>>, %arg4: memref<128x128xf32, #tpu.memory_space<vmem>>, %arg5: memref<3x128xf32, #tpu.memory_space<vmem>>, %arg6: memref<8x128xf32, #tpu.memory_space<vmem>>) attributes {dimension_semantics = [#tpu.dimension_semantics<parallel>], iteration_bounds = array<i64: 2>, scalar_prefetch = 0 : i64, scratch_operands = 0 : i64, tpu.core_type = #tpu.core_type<tc>, window_params = [{transform_indices = @transform_0, window_bounds = array<i64: 8, 8>}, {pipeline_mode = #tpu.pipeline_mode<synchronous>, transform_indices = @transform_1, window_bounds = array<i64: 8, 384>}, {pipeline_mode = #tpu.pipeline_mode<synchronous>, transform_indices = @transform_2, window_bounds = array<i64: 1, 384>}, {pipeline_mode = #tpu.pipeline_mode<synchronous>, transform_indices = @transform_3, window_bounds = array<i64: 128, 128>}, {pipeline_mode = #tpu.pipeline_mode<synchronous>, transform_indices = @transform_4, window_bounds = array<i64: 3, 128>}, {transform_indices = @transform_5, window_bounds = array<i64: 8, 128>}]} {
    %c0 = arith.constant 0 : index
    %c0_0 = arith.constant 0 : index
    %0 = vector.load %arg1[%c0, %c0_0] : memref<8x8xf32, #tpu.memory_space<vmem>>, vector<8x8xf32>
    %c0_1 = arith.constant 0 : index
    %c0_2 = arith.constant 0 : index
    %1 = vector.load %arg2[%c0_1, %c0_2] : memref<8x384xf32, #tpu.memory_space<vmem>>, vector<8x384xf32>
    %cst = arith.constant dense<0.000000e+00> : vector<8x384xf32>
    %2 = tpu.matmul %0, %1, %cst {dimension_numbers = #tpu.dot_dimension_numbers<[1], [0], [0], [1], [0, 0, 1, 1], [], []>} : vector<8x8xf32>, vector<8x384xf32>, vector<8x384xf32> -> vector<8x384xf32>
    %c0_3 = arith.constant 0 : index
    %c0_4 = arith.constant 0 : index
    %3 = vector.load %arg3[%c0_3, %c0_4] : memref<1x384xf32, #tpu.memory_space<vmem>>, vector<1x384xf32>
    %4 = vector.broadcast %3 : vector<1x384xf32> to vector<8x384xf32>
    %5 = arith.addf %2, %4 : vector<8x384xf32>
    %6 = vector.extract_strided_slice %5 {offsets = [0, 0], sizes = [8, 128], strides = [1, 1]} : vector<8x384xf32> to vector<8x128xf32>
    %7 = vector.extract_strided_slice %5 {offsets = [0, 128], sizes = [8, 128], strides = [1, 1]} : vector<8x384xf32> to vector<8x128xf32>
    %8 = vector.extract_strided_slice %5 {offsets = [0, 256], sizes = [8, 128], strides = [1, 1]} : vector<8x384xf32> to vector<8x128xf32>
    %cst_5 = arith.constant 0.000000e+00 : f32
    %9 = vector.broadcast %cst_5 : f32 to vector<8x128xf32>
    %10 = arith.cmpf ogt, %6, %9 : vector<8x128xf32>
    %cst_6 = arith.constant 0.000000e+00 : f32
    %11 = vector.broadcast %cst_6 : f32 to vector<8x128xf32>
    %12 = arith.minimumf %6, %11 : vector<8x128xf32>
    %13 = math.exp %12 : vector<8x128xf32>
    %cst_7 = arith.constant 1.000000e+00 : f32
    %14 = vector.broadcast %cst_7 : f32 to vector<8x128xf32>
    %15 = arith.subf %13, %14 : vector<8x128xf32>
    %16 = arith.select %10, %6, %15 : vector<8x128xi1>, vector<8x128xf32>
    %c0_8 = arith.constant 0 : index
    %c0_9 = arith.constant 0 : index
    %17 = vector.load %arg4[%c0_8, %c0_9] : memref<128x128xf32, #tpu.memory_space<vmem>>, vector<128x128xf32>
    %cst_10 = arith.constant dense<0.000000e+00> : vector<8x128xf32>
    %18 = tpu.matmul %16, %17, %cst_10 {dimension_numbers = #tpu.dot_dimension_numbers<[1], [0], [0], [1], [0, 0, 1, 1], [], []>} : vector<8x128xf32>, vector<128x128xf32>, vector<8x128xf32> -> vector<8x128xf32>
    %c0_11 = arith.constant 0 : index
    %c0_12 = arith.constant 0 : index
    %19 = vector.load %arg5[%c0_11, %c0_12] : memref<3x128xf32, #tpu.memory_space<vmem>>, vector<1x128xf32>
    %20 = vector.broadcast %19 : vector<1x128xf32> to vector<8x128xf32>
    %21 = arith.addf %18, %20 : vector<8x128xf32>
    %cst_13 = arith.constant -1.000000e+01 : f32
    %cst_14 = arith.constant 1.000000e+01 : f32
    %22 = vector.broadcast %cst_13 : f32 to vector<8x128xf32>
    %23 = arith.maximumf %22, %7 : vector<8x128xf32>
    %24 = vector.broadcast %cst_14 : f32 to vector<8x128xf32>
    %25 = arith.minimumf %24, %23 : vector<8x128xf32>
    %26 = arith.negf %25 : vector<8x128xf32>
    %27 = math.exp %26 : vector<8x128xf32>
    %cst_15 = arith.constant 1.000000e+00 : f32
    %28 = vector.broadcast %cst_15 : f32 to vector<8x128xf32>
    %29 = arith.addf %28, %27 : vector<8x128xf32>
    %30 = arith.divf %28, %29 : vector<8x128xf32>
    %31 = arith.subf %21, %8 : vector<8x128xf32>
    %32 = arith.mulf %30, %31 : vector<8x128xf32>
    %33 = arith.addf %8, %32 : vector<8x128xf32>
    %cst_16 = arith.constant dense<0.000000e+00> : vector<8xf32>
    %34 = vector.multi_reduction <add>, %33, %cst_16 [1] : vector<8x128xf32> to vector<8xf32>
    %35 = vector.shape_cast %34 : vector<8xf32> to vector<8x1xf32>
    %36 = arith.mulf %33, %33 : vector<8x128xf32>
    %cst_17 = arith.constant dense<0.000000e+00> : vector<8xf32>
    %37 = vector.multi_reduction <add>, %36, %cst_17 [1] : vector<8x128xf32> to vector<8xf32>
    %38 = vector.shape_cast %37 : vector<8xf32> to vector<8x1xf32>
    %cst_18 = arith.constant 6.250000e-02 : f32
    %39 = vector.broadcast %cst_18 : f32 to vector<8x1xf32>
    %40 = arith.mulf %35, %39 : vector<8x1xf32>
    %cst_19 = arith.constant 6.250000e-02 : f32
    %41 = vector.broadcast %cst_19 : f32 to vector<8x1xf32>
    %42 = arith.mulf %38, %41 : vector<8x1xf32>
    %43 = arith.mulf %40, %40 : vector<8x1xf32>
    %44 = arith.subf %42, %43 : vector<8x1xf32>
    %cst_20 = arith.constant 0.000000e+00 : f32
    %45 = vector.broadcast %cst_20 : f32 to vector<8x1xf32>
    %46 = arith.maximumf %44, %45 : vector<8x1xf32>
    %47 = vector.broadcast %40 : vector<8x1xf32> to vector<8x128xf32>
    %48 = arith.subf %33, %47 : vector<8x128xf32>
    %cst_21 = arith.constant 9.99999974E-6 : f32
    %49 = vector.broadcast %cst_21 : f32 to vector<8x1xf32>
    %50 = arith.addf %46, %49 : vector<8x1xf32>
    %51 = math.rsqrt %50 : vector<8x1xf32>
    %52 = vector.broadcast %51 : vector<8x1xf32> to vector<8x128xf32>
    %53 = arith.mulf %48, %52 : vector<8x128xf32>
    %c1 = arith.constant 1 : index
    %c0_22 = arith.constant 0 : index
    %54 = vector.load %arg5[%c1, %c0_22] : memref<3x128xf32, #tpu.memory_space<vmem>>, vector<1x128xf32>
    %55 = vector.broadcast %54 : vector<1x128xf32> to vector<8x128xf32>
    %56 = arith.mulf %53, %55 : vector<8x128xf32>
    %c2 = arith.constant 2 : index
    %c0_23 = arith.constant 0 : index
    %57 = vector.load %arg5[%c2, %c0_23] : memref<3x128xf32, #tpu.memory_space<vmem>>, vector<1x128xf32>
    %58 = vector.broadcast %57 : vector<1x128xf32> to vector<8x128xf32>
    %59 = arith.addf %56, %58 : vector<8x128xf32>
    %c0_24 = arith.constant 0 : index
    %c0_25 = arith.constant 0 : index
    %60 = vector.load %arg6[%c0_24, %c0_25] : memref<8x128xf32, #tpu.memory_space<vmem>>, vector<8x128xf32>
    tpu.vector_store %arg6[%c0_24, %c0_25], %59 {strides = array<i32>} : memref<8x128xf32, #tpu.memory_space<vmem>>, vector<8x128xf32>,
    return
  }
  func.func @transform_0(%arg0: i32) -> (i32, i32) {
    %c0_i32 = arith.constant 0 : i32
    %c0_i32_0 = arith.constant 0 : i32
    return %arg0, %c0_i32 : i32, i32
  }
  func.func @transform_1(%arg0: i32) -> (i32, i32) {
    %c0_i32 = arith.constant 0 : i32
    %c0_i32_0 = arith.constant 0 : i32
    %c0_i32_1 = arith.constant 0 : i32
    return %c0_i32, %c0_i32_0 : i32, i32
  }
  func.func @transform_2(%arg0: i32) -> (i32, i32) {
    %c0_i32 = arith.constant 0 : i32
    %c0_i32_0 = arith.constant 0 : i32
    %c0_i32_1 = arith.constant 0 : i32
    return %c0_i32, %c0_i32_0 : i32, i32
  }
  func.func @transform_3(%arg0: i32) -> (i32, i32) {
    %c0_i32 = arith.constant 0 : i32
    %c0_i32_0 = arith.constant 0 : i32
    %c0_i32_1 = arith.constant 0 : i32
    return %c0_i32, %c0_i32_0 : i32, i32
  }
  func.func @transform_4(%arg0: i32) -> (i32, i32) {
    %c0_i32 = arith.constant 0 : i32
    %c0_i32_0 = arith.constant 0 : i32
    %c0_i32_1 = arith.constant 0 : i32
    return %c0_i32, %c0_i32_0 : i32, i32
  }
  func.func @transform_5(%arg0: i32) -> (i32, i32) {
    %c0_i32 = arith.constant 0 : i32
    %c0_i32_0 = arith.constant 0 : i32
    return %arg0, %c0_i32 : i32, i32
  }
}

</mosaic_0001>

<bundles_post_ra>
// kernel: tpu_custom_call.1
= control target key start
LH: loop header
LB: loop body
LE: loop exit
PB: predicated region body
PF: predicated region fallthrough
CT: control target
= control target key end

     0   :  { %10 = vsyncpa [#allocation3], 0  ;;  %s1124_s0 = inlined_call_operand.vmem [shape: f32[16,8], index: 0, kind: input, shape index: {}]   ;;  %s1125_s1 = inlined_call_operand.vmem [shape: f32[8,384], index: 1, kind: input, shape index: {}]   ;;  %s1126_s2 = inlined_call_operand.hbm [shape: f32[1,384], index: 2, kind: input, shape index: {}]   ;;  %s1127_s3 = inlined_call_operand.hbm [shape: f32[128,128], index: 3, kind: input, shape index: {}]   ;;  %s1128_s4 = inlined_call_operand.vmem [shape: f32[3,128], index: 4, kind: input, shape index: {}]   ;;  %s1129_s5 = inlined_call_operand.hbm [shape: f32[16,128], index: 5, kind: output, shape index: {}]  }
   0x1   :  { %11 = vsyncpa [#allocation6], 0 }
   0x2   :  { %12 = vsyncpa [#allocation4], 0 }
   0x3   :  { %14 = vsyncpa [#allocation4 + $0x1], 0  ;;  %s956_s18 = smov 0   ;;  %s958_s19 = smov 0  }
   0x4   :  { %s960_s20 = smov 0   ;;  %s962_s21 = smov 0  }
   0x5 LB: > { %s977_s22 = sadd.s32 4294967295, %s917_s21   ;;  %s644_s23 = sadd.s32 4294967294, %s917_s21   ;;  %s917_s21 = sphi %s962_s21, %s1147_s21   ;;  %s913_s20 = sphi %s960_s20, %s1146_s20   ;;  %s909_s19 = sphi %s958_s19, %s1145_s19   ;;  %s905_s18 = sphi %s956_s18, %s1144_s18  }
   0x6   : > { %s981_s24 = sadd.s32 1, %s917_s21   ;;  %s137_s25 = sadd.s32 1, %s913_s20 }
   0x7   : > { %s134_s26 = ssub.s32 %s917_s21, %s981_s24  ;;  %p147_p0 = scmp.ne.s32.totalorder %s913_s20, %s909_s19 }
   0x8   : > { %p135_p1 = scmp.eq.s32.totalorder %s134_s26, 0  ;;  %p148_p2 = scmp.eq.s32.totalorder %s977_s22, 1 }
   0x9   : > { %p153_p3 = scmp.ne.s32.totalorder %s909_s19, %s905_s18  ;;  %p154_p4 = scmp.eq.s32.totalorder %s644_s23, 1 }
   0xa   : > { %s992_s27 = scalar_select %p135_p1, %s913_s20, %s137_s25  }
   0xb   : > { %p994_p5 = por %p148_p2, %p147_p0  ;;  %p998_p6 = por %p154_p4, %p153_p3 }
   0xc   : > { %p645_p7 = scmp.ge.s32.totalorder %s917_s21, 1  ;;  %p161_p8 = scmp.lt.s32.totalorder %s917_s21, 3 }
   0xd   : > { %s1133_s28 = scalar_select %p994_p5, 1, 0 }
   0xe   : > { %s1134_s29 = scalar_select %p998_p6, 1, 0 }
   0xf   : > { %p1130_p9 = scmp.eq.s32.totalorder %s977_s22, 0  ;;  %p1005_p10 = pnand %p645_p7, %p161_p8 }
  0x10   : > { %s919_s6 = smov [#allocation2]   ;;  %s920_s8 = smov [#allocation5]  }
  0x11   : > { %s1135_s30 = scalar_select %p1005_p10, 1, 0 }
  0x12   : > { %s177_s7 = sshll.u32 %s919_s6, 4  ;;  %p735_p11 = pneg %p1005_p10  ;;  %s178_s7 = int_to_ptr.vmem [resolvable:$true] %s177_s7 }
  0x13   : > { %s187_s9 = sshll.u32 %s920_s8, 4  ;;  %s808_s11 = scalar_lea.vmem %s178_s7, 48  ;;  %s188_s9 = int_to_ptr.vmem [resolvable:$true] %s187_s9 }
  0x14   : > { %p1013_p12 = pnand %p1130_p9, %p735_p11  ;;  %p809_p0 = scmp.ne.s32.totalorder %s178_s7, %s808_s11 }
  0x15   : > { %s815_s12 = scalar_lea.vmem %s178_s7, 64  ;;  %p816_p3 = scmp.lt.s32.totalorder %s178_s7, %s178_s7 }
  0x16   : > { %p799_p13 = pneg %p1013_p12  ;;  %p817_p4 = scmp.lt.s32.totalorder %s815_s12, %s808_s11 }
  0x18   : > { %p811_p1 = pnand %p809_p0, %p799_p13  ;;  %p818_p7 = por %p817_p4, %p816_p3 }
  0x1a   : > { %p812_p2 = pneg %p811_p1 }
  0x1c   : > { %p819_p8 = pnand %p818_p7, %p812_p2 }
  0x1e   : > { %822 = shalt.err (!%p819_p8)
}
  0x1f   : > { %738 = dma.hbm_to_vmem [thread:$0]  (!%p1013_p12), %s1126_s2, 48, %s178_s7, [#allocation3]  }
  0x20   : > { %s834_s15 = scalar_lea.vmem %s188_s9, 2048  ;;  %p842_p1 = scmp.lt.s32.totalorder %s188_s9, %s188_s9 }
  0x21   : > { %p835_p11 = scmp.ne.s32.totalorder %s188_s9, %s834_s15  ;;  %p843_p6 = scmp.lt.s32.totalorder %s834_s15, %s834_s15 }
  0x23   : > { %p837_p9 = pnand %p835_p11, %p799_p13  ;;  %p844_p5 = por %p843_p6, %p842_p1 }
  0x25   : > { %p838_p0 = pneg %p837_p9 }
  0x27   : > { %p845_p10 = pnand %p844_p5, %p838_p0 }
  0x29   : > { %848 = shalt.err (!%p845_p10)
}
  0x2a   : > { %s921_s16 = smov 128   ;;  %s922_s17 = smov 8  }
  0x2b   : > { %741 = dma.hbm_to_vmem [thread:$0]  (!%p1013_p12), %s1127_s3, 2048, %s188_s9, [#allocation6], %s921_s16, %s921_s16, %s922_s17  }
  0x2c   : > { %p1137_p2 = scmp.ne.s32.totalorder %s1135_s30, 0 }
  0x2d   : > { %p1138_p3 = scmp.eq.s32.totalorder (!%p1137_p2), %s977_s22, 0 }
  0x2e   : > { %213 = sbr.rel (%p1137_p2) target bundleno = 662 (0x296), region = 40 }
  0x33   : > { %892 = dma.done.wait (%p1138_p3), [#allocation3], 48   ;;  %p1139_p9 = pmov %p1138_p3 }
  0x34   : > { %p1140_p5 = pmov %p1138_p3 }
  0x35   : > { %894 = vsyncadd (%p1139_p9), [#allocation3], 4294967248 }
  0x36   : > { %896 = dma.done.wait (%p1140_p5), [#allocation6], 2048   ;;  %p1141_p6 = pmov %p1138_p3 }
  0x37   : > { %p244_p10 = scmp.lt.s32.totalorder %s977_s22, 1  ;;  %v923_v0 = vmov 0.0   ;;  %v250_v1 = vld [vmem:[%s1125_s1 + $0x8] sm:$0xff]  ;;  %v249_v2 = vld [vmem:[%s1125_s1] sm:$0xff]  ;;  %vm269_vm0 = vcmask 64512   ;;  %v434_v5 = vld [vmem:[#allocation5 + $0x70] sm:$0xff]  ;;  %v254_v21 = vlaneseq }
  0x38   : > { %898 = vsyncadd (%p1141_p6), [#allocation6], 4294965248  ;;  %337 = vmatprep.mubr.f32.mxu1 %v923_v0  ;;  %690 = vmatprep.subr.mxu0 %v923_v0  ;;  %v435_v4 = vld [vmem:[#allocation5 + $0x78] sm:$0xff]  ;;  %v433_v6 = vld [vmem:[#allocation5 + $0x68] sm:$0xff]  ;;  %vm924_vm1 = vmmov 0   ;;  %s241_s17 = sand.u32 1, %s909_s19  }
  0x39   : > { %s245_s26 = scalar_select %p244_p10, %s977_s22, 1  ;;  %303 = vmatprep.subr.mxu1 %v250_v1  ;;  %691 = vmatpush3.msra.mxu0 %v435_v4  ;;  %v432_v7 = vld [vmem:[#allocation5 + $0x60] sm:$0xff]  ;;  %v431_v8 = vld [vmem:[#allocation5 + $0x58] sm:$0xff]  ;;  %v430_v9 = vld [vmem:[#allocation5 + $0x50] sm:$0xff]  ;;  %v255_v22 = vshrl.u32 %v254_v21, 7 }
  0x3a   : > { %304 = vmatpush1.msra.mxu1 %v249_v2  ;;  %692 = vmatprep.subr.mxu0 %v923_v0  ;;  %v429_v10 = vld [vmem:[#allocation5 + $0x48] sm:$0xff]  ;;  %v428_v11 = vld [vmem:[#allocation5 + $0x40] sm:$0xff]  ;;  %v427_v12 = vld [vmem:[#allocation5 + $0x38] sm:$0xff]  ;;  %s652_s23 = sshll.u32 %s241_s17, 3  ;;  %s663_s7 = sshll.u32 %s977_s22, 7 }
  0x3b   : > { %s653_s30 = sshll.u32 %s245_s26, 3  ;;  %693 = vmatpush3.msra.mxu0 %v434_v5  ;;  %685 = vmatprep.subr.mxu1 %v923_v0  ;;  %v426_v13 = vld [vmem:[#allocation5 + $0x30] sm:$0xff]  ;;  %v425_v14 = vld [vmem:[#allocation5 + $0x28] sm:$0xff]  ;;  %v424_v15 = vld [vmem:[#allocation5 + $0x20] sm:$0xff]  ;;  %v256_v23 = vsub.s32 0, %v255_v22  ;;  %v260_v36 = vsub.s32 1, %v255_v22  ;;  %s561_s12 = scalar_lea.hbm %s1129_s5, %s663_s7 }
  0x3c   : > { %s247_s8 = scalar_lea.vmem %s1124_s0, %s653_s30  ;;  %694 = vmatprep.subr.mxu0 %v923_v0  ;;  %v423_v16 = vld [vmem:[#allocation5 + $0x18] sm:$0xff]  ;;  %v422_v17 = vld [vmem:[#allocation5 + $0x10] sm:$0xff]  ;;  %v421_v19 = vld [vmem:[#allocation5 + $0x8] sm:$0xff]  ;;  %722 = vmatprep.mubr.msk.f32.mxu0 %vm924_vm1, %v923_v0  ;;  %v264_v43 = vsub.s32 2, %v255_v22  ;;  %s550_s13 = scalar_lea.sflag [#allocation4], %s241_s17 }
  0x3d   : > { %v248_v3 = vld [vmem:[%s247_s8] sm:$0xff]  ;;  %695 = vmatpush3.msra.mxu0 %v433_v6  ;;  %v251_v18 = vld [vmem:[%s1125_s1 + $0x10] sm:$0xff]  ;;  %s243_s8 = scalar_lea.vmem [#allocation7], %s652_s23  ;;  %p1142_p13 = scmp.ne.s32.totalorder %s1133_s28, 0 }
  0x3e   : > { %654 = vmatmul.mubr.msk.f32.vlgmr.msra.gmra.mxu1 %vm269_vm0, %v248_v3  ;;  %696 = vmatprep.subr.mxu0 %v923_v0  ;;  %v420_v20 = vld [vmem:[#allocation5] sm:$0xff]  ;;  %v252_v24 = vld [vmem:[#allocation2] sm:$0x7]  ;;  %s563_s9 = sshll.u32 %s243_s8, 4  ;;  %s925_s15 = smov [#allocation7]   ;;  %s564_s9 = int_to_ptr.vmem [resolvable:$true] %s563_s9 }
  0x3f   : > { %697 = vmatpush3.msra.mxu0 %v432_v7  ;;  %686 = vmatpush3.msra.mxu1 %v251_v18  ;;  %v257_v25 = vrot.slane %v252_v24, %v256_v23  ;;  %v261_v37 = vrot.slane %v252_v24, %v260_v36  ;;  %v265_v44 = vrot.slane %v252_v24, %v264_v43  ;;  %v657_v45 = vld [vmem:[%s1128_s4] ss:$0 sm:$0xff]  ;;  %v660_v1 = vld [vmem:[%s1128_s4 + $0x1] ss:$0 sm:$0xff]  ;;  %s849_s14 = scalar_lea.vmem %s564_s9, 128  ;;  %s853_s16 = sshll.u32 %s925_s15, 4  ;;  %s854_s16 = int_to_ptr.vmem [resolvable:$false] %s853_s16 }
  0x40   : > { %698 = vmatprep.subr.mxu0 %v923_v0  ;;  %687 = vmatprep.mubr.msk.f32.mxu1 %vm924_vm1, %v923_v0  ;;  %p850_p12 = scmp.ne.s32.totalorder %s564_s9, %s849_s14  ;;  %s855_s22 = scalar_lea.vmem %s854_s16, 256 }
  0x41   : > { %699 = vmatpush3.msra.mxu0 %v431_v8  ;;  %p856_p8 = scmp.lt.s32.totalorder %s564_s9, %s854_s16  ;;  %p857_p11 = scmp.lt.s32.totalorder %s855_s22, %s849_s14 }
  0x42   : > { %700 = vmatprep.subr.mxu0 %v923_v0  ;;  %688 = vmatmul.mubr.msk.f32.vlgmr.msra.gmra.mxu1 %vm269_vm0, %v248_v3  ;;  %v661_v3 = vld [vmem:[%s1128_s4 + $0x2] ss:$0 sm:$0xff]  ;;  %p851_p4 = pnand %p850_p12, %p1142_p13 }
  0x43   : > { %701 = vmatpush3.msra.mxu0 %v430_v9  ;;  %p858_p0 = por %p857_p11, %p856_p8 }
  0x44   : > { %702 = vmatprep.subr.mxu0 %v923_v0  ;;  %p852_p7 = pneg %p851_p4 }
  0x45   : > { %703 = vmatpush3.msra.mxu0 %v429_v10 }
  0x46   : > { %704 = vmatprep.subr.mxu0 %v923_v0  ;;  %p859_p1 = pnand %p858_p0, %p852_p7 }
  0x47   : > { %705 = vmatpush3.msra.mxu0 %v428_v11 }
  0x48   : > { %706 = vmatprep.subr.mxu0 %v923_v0 }
  0x49   : > { %707 = vmatpush3.msra.mxu0 %v427_v12 }
  0x4a   : > { %708 = vmatprep.subr.mxu0 %v923_v0 }
  0x4b   : > { %709 = vmatpush3.msra.mxu0 %v426_v13 }
  0x4c   : > { %710 = vmatprep.subr.mxu0 %v923_v0 }
  0x4d   : > { %711 = vmatpush3.msra.mxu0 %v425_v14 }
  0x4e   : > { %712 = vmatprep.subr.mxu0 %v923_v0 }
  0x4f   : > { %713 = vmatpush3.msra.mxu0 %v424_v15 }
  0x50   : > { %714 = vmatprep.subr.mxu0 %v923_v0 }
  0x51   : > { %715 = vmatpush3.msra.mxu0 %v423_v16 }
  0x52   : > { %716 = vmatprep.subr.mxu0 %v923_v0 }
  0x53   : > { %717 = vmatpush3.msra.mxu0 %v422_v17 }
  0x54   : > { %718 = vmatprep.subr.mxu0 %v923_v0 }
  0x55   : > { %719 = vmatpush3.msra.mxu0 %v421_v19 }
  0x56   : > { %720 = vmatprep.subr.mxu0 %v923_v0 }
  0x57   : > { %721 = vmatpush3.msra.mxu0 %v420_v20 }
  0xfe   : > { %v339_v26 = vpop.f32.mrf.mxu1 }
  0xff   : > { %v340_v27 = vadd.f32 %v339_v26, %v257_v25 }
 0x100   : > { %v341_v33 = vpop.f32.mrf.mxu1 }
 0x101   : > { %v415_v28 = vmin.f32 %v340_v27, 0.0  ;;  %vm414_vm2 = vcmp.gt.f32.partialorder %v340_v27, 0.0  ;;  %v342_v38 = vadd.f32 %v341_v33, %v261_v37 }
 0x102   : > { %v410_v34 = vpop.f32.mrf.mxu1 }
 0x103   : > { %v416_v29 = vmul.f32 1.442695, %v415_v28  ;;  %v658_v39 = vclamps-f32 %v342_v38, 10.0  ;;  %v411_v46 = vadd.f32 %v410_v34, %v265_v44 }
 0x104   : > { %v689_v35 = vpop.f32.mrf.mxu1 }
 0x105   : > { %789 = vpow2.f32 %v416_v29  ;;  %v659_v40 = vmul.f32 -1.442695, %v658_v39 }
 0x107   : > { %791 = vpow2.f32 %v659_v40 }
 0x112   : > { %v790_v30 = vpop.eup %789 }
 0x113   : > { %v656_v31 = vadd.f32 -1.0, %v790_v30 }
 0x114   : > { %v792_v41 = vpop.eup %791 }
 0x115   : > { %v419_v32 = vsel %vm414_vm2, %v340_v27, %v656_v31  ;;  %v516_v42 = vadd.f32 1.0, %v792_v41 }
 0x116   : > { %723 = vmatmul.mubr.f32.vlgmr.msra.gmra.mxu0 %v419_v32 }
 0x117   : > { %793 = vrcp.f32 %v516_v42 }
 0x124   : > { %v794_v51 = vpop.eup %793 }
 0x1d6   : > { %v507_v47 = vpop.f32.mrf.mxu0 }
 0x1d7   : > { %v508_v48 = vadd.f32 %v657_v45, %v507_v47 }
 0x1d8   : > { %v724_v49 = vpop.f32.mrf.mxu0 }
 0x1d9   : > { %v519_v50 = vsub.f32 %v508_v48, %v411_v46 }
 0x1db   : > { %v520_v52 = vmul.f32 %v794_v51, %v519_v50 }
 0x1dd   : > { %v521_v53 = vadd.f32 %v520_v52, %v411_v46 }
 0x1df   : > { %522 = vadd.xlane.f32.xlu0 %v521_v53  ;;  %v524_v54 = vmul.f32 %v521_v53, %v521_v53 }
 0x1e3   : > { %525 = vadd.xlane.f32.xlu0 %v524_v54 }
 0x268   : > { %v523_v55 = vpop.xlane.xlu0 %522 }
 0x269   : > { %v527_v56 = vmul.f32 0.0625, %v523_v55 }
 0x26b   : > { %v529_v58 = vmul.f32 %v527_v56, %v527_v56  ;;  %v532_v63 = vsub.f32 %v521_v53, %v527_v56 }
 0x26c   : > { %v526_v57 = vpop.xlane.xlu0 %525 }
 0x26d   : > { %v528_v59 = vmul.f32 0.0625, %v526_v57 }
 0x26f   : > { %v530_v60 = vsub.f32 %v528_v59, %v529_v58 }
 0x271   : > { %v531_v61 = vmax.f32 %v530_v60, 0.0 }
 0x273   : > { %v533_v62 = vadd.f32 1e-05, %v531_v61 }
 0x275   : > { %795 = vrsqrt.f32 %v533_v62 }
 0x282   : > { %v796_v0 = vpop.eup %795 }
 0x283   : > { %v535_v2 = vmul.f32 %v796_v0, %v532_v63 }
 0x285   : > { %v541_v4 = vmul.f32 %v660_v1, %v535_v2 }
 0x287   : > { %v547_v5 = vadd.f32 %v661_v3, %v541_v4 }
 0x289   : > { %548 = vst [vmem:[%s243_s8] sm:$0xff] %v547_v5 }
 0x28a   : > { %862 = shalt.err (!%p859_p1)
}
 0x28b   : > { %s863_s23 = scalar_lea.hbm %s561_s12, 128  ;;  %s867_s26 = scalar_lea.hbm %s1129_s5, 256 }
 0x28c   : > { %p864_p2 = scmp.ne.s32.totalorder %s561_s12, %s863_s23  ;;  %p868_p5 = scmp.lt.s32.totalorder %s561_s12, %s1129_s5 }
 0x28d   : > { %p869_p6 = scmp.lt.s32.totalorder %s867_s26, %s863_s23 }
 0x28e   : > { %p865_p3 = pnand %p864_p2, %p1142_p13 }
 0x28f   : > { %p870_p10 = por %p869_p6, %p868_p5 }
 0x290   : > { %p866_p9 = pneg %p865_p3 }
 0x292   : > { %p871_p12 = pnand %p870_p10, %p866_p9 }
 0x294   : > { %874 = shalt.err (!%p871_p12)
}
 0x295   : > { %733 = dma.vmem_to_hbm [thread:$0]  (%p1142_p13), %s564_s9, 128, %s561_s12, %s550_s13  }
 0x296 PF: > { %p750_p4 = scmp.ge.s32.totalorder %s917_s21, 2  ;;  %s575_s7 = sand.u32 1, %s905_s18  }
 0x297   : > { %p1143_p7 = scmp.ne.s32.totalorder %s1134_s29, 0  ;;  %s576_s8 = scalar_lea.sflag [#allocation4], %s575_s7 }
 0x299   : > { %p743_p8 = pnand %p750_p4, %p1143_p7 }
 0x29b   : > { %p744_p11 = pneg %p743_p8 }
 0x29d   : > { %900 = dma.done.wait (%p744_p11), %s576_s8, 128  }
 0x29e   : > { %902 = vsyncadd (%p744_p11), %s576_s8, 4294967168  ;;  %p17_p0 = scmp.ge.s32.totalorder %s981_s24, 4   ;;  %s1144_s18 = smov %s909_s19 }
 0x29f   : > { %s1145_s19 = smov %s913_s20  ;;  %s1146_s20 = smov %s992_s27 }
 0x2a0   : > { %s1147_s21 = smov %s981_s24  ;;  %19 = sbr.rel (!%p17_p0) target bundleno = 5 (0x5), region = 84 }
 0x2a5   :  { %581 = vsyncpa [#allocation3], 1 }
 0x2a6   :  { %583 = vsyncpa [#allocation3 + $0x1], 1 }
 0x2a7   :  { %584 = vsyncpa [#allocation6], 1 }
 0x2a8   :  { %585 = vsyncpa [#allocation4], 1 }
 0x2a9   :  { %587 = vsyncpa [#allocation4 + $0x1], 1 }

</bundles_post_ra>
